<compile_context>
chip_gen: v6e
topology: v6e:2x2x1
jax: 0.10.0
libtpu: 0.0.40
codegen_flags: <defaults>
</compile_context>

<pallas_src>
import functools

import jax
import jax.numpy as jnp
from jax.experimental import pallas as pl
from jax.experimental.pallas import tpu as pltpu


def _device_kind():
    try:
        return jax.devices()[0].device_kind.lower()
    except Exception:
        return ""


def _compute_dtype(in_dtype, prefer_native_lowp):
    dt = jnp.dtype(in_dtype)
    if jnp.issubdtype(dt, jnp.floating):
        if dt == jnp.dtype(jnp.float32):
            return jnp.float32
        if prefer_native_lowp and dt == jnp.dtype(jnp.bfloat16):
            return jnp.bfloat16          # v6e/v7x VPU/XLU are bf16-native
        return jnp.float32               # v5e (no bf16 VPU) / f16 / unknown
    return jnp.int32                     # integer / bool maps


def _tile_plan(B, HW, in_itemsize, kind):
    """Pick (tb, t_hw, HW_pad) under a per-generation VMEM budget."""
    HW_pad = ((HW + 127) // 128) * 128
    if "v7" in kind:
        target = 6 << 20      # 3.2 TB/s HBM: bigger tiles amortize ~0.35us/step
    elif "v6" in kind:
        target = 4 << 20
    else:                     # v5e / older / unknown: 16 MiB scoped-VMEM default
        target = (2 << 20) if in_itemsize >= 4 else (1 << 20)

    # Lane-dense output needs tb % 128 == 0 or tb == B.
    min_tb = B if B <= 128 else 128
    row_bytes = HW_pad * in_itemsize

    if min_tb * row_bytes <= target:
        # Whole (padded) channel-0 row fits per step; grow the batch tile.
        cand = HW_pad
        tb = B if B <= 128 else min(B, max(128, (target // row_bytes) // 128 * 128))
    else:
        # Large maps: minimal batch tile, split the HW axis across the grid and
        # carry a running (max, argmax) accumulator in VMEM scratch.
        tb = min_tb
        cand = max(128, (target // (tb * in_itemsize)) // 128 * 128)

    # Bound the in-kernel static unroll (t_hw / 128 lane-blocks) to 64 and
    # balance hw blocks so at most ~127 wasted lanes are read per row.
    cand = min(cand, HW_pad, 64 * 128)
    nhw = -(-HW_pad // cand)
    t_hw = ((-(-HW_pad // nhw)) + 127) // 128 * 128

    # Keep the (tb,128) value/index scratch bounded (<= ~2 MiB).
    tb = min(tb, 2048)
    # v7x: >= 2 blocks on the "parallel" batch axis so both TensorCores work.
    if "v7" in kind and B >= 256:
        tb = min(tb, max(128, (B // 2) // 128 * 128))
    return tb, t_hw, HW_pad


def _pos_argmax_kernel(x_ref, out_ref, bv_ref, bi_ref, *,
                       hw, t_hw, comp_dtype, needs_mask):
    # x_ref:   (tb, t_hw) native-dtype window of the (B, C*HW) view, VMEM
    # out_ref: (1, tb)    int32 lane-dense argmax indices, VMEM
    # bv_ref/bi_ref: (tb, 128) running best value / flat index (scratch)
    j = pl.program_id(1)
    nj = pl.num_programs(1)
    floating = jnp.issubdtype(jnp.dtype(comp_dtype), jnp.floating)
    neg = jnp.array(-jnp.inf if floating else jnp.iinfo(comp_dtype).min,
                    dtype=comp_dtype)

    @pl.when(j == 0)
    def _init():
        bv_ref[...] = jnp.full(bv_ref.shape, neg, dtype=comp_dtype)
        bi_ref[...] = jnp.zeros(bi_ref.shape, jnp.int32)

    lane = jax.lax.broadcasted_iota(jnp.int32, (1, 128), 1)   # (1,128), not (tb,hw)
    base = j * t_hw
    bv = bv_ref[...]
    bi = bi_ref[...]
    # Static unroll over 128-lane columns; temporaries stay vreg-column sized
    # (the ref is sliced per column, no widened full-tile copy).
    for s in range(t_hw // 128):
        xs = x_ref[:, s * 128:(s + 1) * 128].astype(comp_dtype)   # (tb, 128)
        flat = base + (s * 128) + lane                            # (1, 128)
        if needs_mask:
            xs = jnp.where(flat < hw, xs, neg)   # kill padded / channel-1 lanes
        upd = xs > bv                            # strict ">": first occurrence wins
        bv = jnp.where(upd, xs, bv)
        bi = jnp.where(upd, flat, bi)
    bv_ref[...] = bv
    bi_ref[...] = bi

    @pl.when(j == nj - 1)
    def _finalize():
        # Single in-vreg argmax of the surviving (tb,128) column.
        mx = jnp.max(bv, axis=-1, keepdims=True)            # (tb, 1)
        cand = jnp.where(bv == mx, bi, jnp.int32(hw))
        am = jnp.min(cand, axis=-1).astype(jnp.int32)       # (tb,)
        out_ref[...] = am.reshape(1, am.shape[0])            # lane-dense store


def pos_abs_f(inputs):
    """abs_f: NCHW map observation -> abstraction indices (B,) int32
    (argmax over channel 0's flattened H*W positions, n_abs == H*W)."""
    B, C, H, W = inputs.shape
    HW = H * W

    # Free, contiguous reshape: channel 0 is the first HW lanes of every
    # (C*H*W)-row.  The kernel DMAs a round_up(HW,128)-lane window from this
    # view and masks lanes >= HW on-chip — no wrapper-side slice copy.
    x2d = inputs.reshape(B, C * HW)

    kind = _device_kind()
    in_item = jnp.dtype(x2d.dtype).itemsize
    comp_dtype = _compute_dtype(
        x2d.dtype, prefer_native_lowp=("v6" in kind or "v7" in kind))
    comp_item = jnp.dtype(comp_dtype).itemsize

    tb, t_hw, HW_pad = _tile_plan(B, HW, in_item, kind)
    nb = pl.cdiv(B, tb)
    nhw = pl.cdiv(HW_pad, t_hw)
    needs_mask = (nhw * t_hw) != HW

    # Explicit VMEM budget: double-buffered input tile + output + scratch + slack.
    est = (2 * tb * t_hw * in_item + 2 * tb * 4
           + tb * 128 * (comp_item + 4) + (1 << 20))
    vmem_limit = int(min(48 << 20, max(16 << 20, 2 * est)))

    kernel = functools.partial(_pos_argmax_kernel, hw=HW, t_hw=t_hw,
                               comp_dtype=comp_dtype, needs_mask=needs_mask)

    out = pl.pallas_call(
        kernel,
        out_shape=jax.ShapeDtypeStruct((1, B), jnp.int32),
        grid=(nb, nhw),
        in_specs=[pl.BlockSpec((tb, t_hw), lambda i, j: (i, j))],
        out_specs=pl.BlockSpec((1, tb), lambda i, j: (0, i)),
        scratch_shapes=[pltpu.VMEM((tb, 128), comp_dtype),
                        pltpu.VMEM((tb, 128), jnp.int32)],
        compiler_params=pltpu.CompilerParams(
            dimension_semantics=("parallel", "arbitrary"),
            vmem_limit_bytes=vmem_limit),
    )(x2d)
    return out[0]


class MapAbstractEncoder:
    """JAX/Pallas port of deep_rl MapAbstractEncoder (no learnable params)."""

    def __init__(self, n_abs, abs_f):
        self.n_abs = n_abs
        self.abs_f = abs_f
        self.feature_dim = self.n_abs
        self.abstract_type = 'pos'

    def get_indices(self, inputs, info):
        return self.abs_f(inputs)

    def forward(self, inputs, info):
        return self.get_indices(inputs, info)

    __call__ = forward


if __name__ == "__main__":
    key = jax.random.PRNGKey(0)
    B, C, H, W = 2, 4, 16, 16
    x = jax.random.normal(key, (B, C, H, W), dtype=jnp.float32)

    n_abs = H * W  # one abstract state per map position
    enc = MapAbstractEncoder(n_abs=n_abs, abs_f=pos_abs_f)

    indices = enc.forward(x, info=None)
    indices = jax.block_until_ready(indices)

    # reference check against plain JAX argmax over channel 0
    ref = jnp.argmax(x[:, 0].reshape(B, -1), axis=-1).astype(jnp.int32)
    assert indices.shape == (B,)
    assert indices.dtype == jnp.int32
    assert bool(jnp.all(indices == ref))

    print("KERNEL_OK")
</pallas_src>

<mosaic_0001>
module attributes {stable_mosaic.version = 11 : i64} {
  func.func @_pos_argmax_kernel(%arg0: i32, %arg1: i32, %arg2: memref<2x256xf32, #tpu.memory_space<vmem>>, %arg3: memref<1x2xi32, #tpu.memory_space<vmem>>, %arg4: memref<2x128xf32, #tpu.memory_space<vmem>>, %arg5: memref<2x128xi32, #tpu.memory_space<vmem>>) attributes {dimension_semantics = [#tpu.dimension_semantics<parallel>, #tpu.dimension_semantics<arbitrary>], iteration_bounds = array<i64: 1, 1>, scalar_prefetch = 0 : i64, scratch_operands = 2 : i64, tpu.core_type = #tpu.core_type<tc>, window_params = [{transform_indices = @transform_0, window_bounds = array<i64: 2, 256>}, {transform_indices = @transform_1, window_bounds = array<i64: 1, 2>}]} {
    %c0_i32 = arith.constant 0 : i32
    %0 = arith.cmpi eq, %arg1, %c0_i32 : i32
    %1 = arith.extui %0 : i1 to i32
    %cst = arith.constant 0xFF800000 : f32
    %c0_i32_0 = arith.constant 0 : i32
    %2 = arith.cmpi ne, %1, %c0_i32_0 : i32
    scf.if %2 {
      %30 = vector.broadcast %cst : f32 to vector<2x128xf32>
      %c0_14 = arith.constant 0 : index
      %c0_15 = arith.constant 0 : index
      %31 = vector.load %arg4[%c0_14, %c0_15] : memref<2x128xf32, #tpu.memory_space<vmem>>, vector<2x128xf32>
      tpu.vector_store %arg4[%c0_14, %c0_15], %30 {strides = array<i32>} : memref<2x128xf32, #tpu.memory_space<vmem>>, vector<2x128xf32>,
      %c0_i32_16 = arith.constant 0 : i32
      %32 = vector.broadcast %c0_i32_16 : i32 to vector<2x128xi32>
      %c0_17 = arith.constant 0 : index
      %c0_18 = arith.constant 0 : index
      %33 = vector.load %arg5[%c0_17, %c0_18] : memref<2x128xi32, #tpu.memory_space<vmem>>, vector<2x128xi32>
      tpu.vector_store %arg5[%c0_17, %c0_18], %32 {strides = array<i32>} : memref<2x128xi32, #tpu.memory_space<vmem>>, vector<2x128xi32>,
    } else {
    }
    %3 = tpu.iota {dimensions = array<i32: 1>} : vector<1x128xi32>
    %c256_i32 = arith.constant 256 : i32
    %4 = arith.muli %arg1, %c256_i32 : i32
    %c0 = arith.constant 0 : index
    %c0_1 = arith.constant 0 : index
    %5 = vector.load %arg4[%c0, %c0_1] : memref<2x128xf32, #tpu.memory_space<vmem>>, vector<2x128xf32>
    %c0_2 = arith.constant 0 : index
    %c0_3 = arith.constant 0 : index
    %6 = vector.load %arg5[%c0_2, %c0_3] : memref<2x128xi32, #tpu.memory_space<vmem>>, vector<2x128xi32>
    %c0_4 = arith.constant 0 : index
    %c0_5 = arith.constant 0 : index
    %7 = vector.load %arg2[%c0_4, %c0_5] : memref<2x256xf32, #tpu.memory_space<vmem>>, vector<2x128xf32>
    %c0_i32_6 = arith.constant 0 : i32
    %8 = arith.addi %4, %c0_i32_6 : i32
    %9 = vector.broadcast %8 : i32 to vector<1x128xi32>
    %10 = arith.addi %9, %3 : vector<1x128xi32>
    %11 = arith.cmpf ogt, %7, %5 : vector<2x128xf32>
    %12 = arith.select %11, %7, %5 : vector<2x128xi1>, vector<2x128xf32>
    %13 = vector.shape_cast %10 : vector<1x128xi32> to vector<1x128xi32>
    %14 = vector.broadcast %13 : vector<1x128xi32> to vector<2x128xi32>
    %15 = arith.select %11, %14, %6 : vector<2x128xi1>, vector<2x128xi32>
    %c0_7 = arith.constant 0 : index
    %c128 = arith.constant 128 : index
    %16 = vector.load %arg2[%c0_7, %c128] : memref<2x256xf32, #tpu.memory_space<vmem>>, vector<2x128xf32>
    %c128_i32 = arith.constant 128 : i32
    %17 = arith.addi %4, %c128_i32 : i32
    %18 = vector.broadcast %17 : i32 to vector<1x128xi32>
    %19 = arith.addi %18, %3 : vector<1x128xi32>
    %20 = arith.cmpf ogt, %16, %12 : vector<2x128xf32>
    %21 = arith.select %20, %16, %12 : vector<2x128xi1>, vector<2x128xf32>
    %22 = vector.shape_cast %19 : vector<1x128xi32> to vector<1x128xi32>
    %23 = vector.broadcast %22 : vector<1x128xi32> to vector<2x128xi32>
    %24 = arith.select %20, %23, %15 : vector<2x128xi1>, vector<2x128xi32>
    %c0_8 = arith.constant 0 : index
    %c0_9 = arith.constant 0 : index
    %25 = vector.load %arg4[%c0_8, %c0_9] : memref<2x128xf32, #tpu.memory_space<vmem>>, vector<2x128xf32>
    tpu.vector_store %arg4[%c0_8, %c0_9], %21 {strides = array<i32>} : memref<2x128xf32, #tpu.memory_space<vmem>>, vector<2x128xf32>,
    %c0_10 = arith.constant 0 : index
    %c0_11 = arith.constant 0 : index
    %26 = vector.load %arg5[%c0_10, %c0_11] : memref<2x128xi32, #tpu.memory_space<vmem>>, vector<2x128xi32>
    tpu.vector_store %arg5[%c0_10, %c0_11], %24 {strides = array<i32>} : memref<2x128xi32, #tpu.memory_space<vmem>>, vector<2x128xi32>,
    %c0_i32_12 = arith.constant 0 : i32
    %27 = arith.cmpi eq, %arg1, %c0_i32_12 : i32
    %28 = arith.extui %27 : i1 to i32
    %c0_i32_13 = arith.constant 0 : i32
    %29 = arith.cmpi ne, %28, %c0_i32_13 : i32
    scf.if %29 {
      %cst_14 = arith.constant dense<0xFF800000> : vector<2xf32>
      %30 = vector.multi_reduction <maximumf>, %21, %cst_14 [1] : vector<2x128xf32> to vector<2xf32>
      %31 = vector.shape_cast %30 : vector<2xf32> to vector<2x1xf32>
      %32 = vector.broadcast %31 : vector<2x1xf32> to vector<2x128xf32>
      %33 = arith.cmpf oeq, %21, %32 : vector<2x128xf32>
      %c256_i32_15 = arith.constant 256 : i32
      %34 = vector.broadcast %c256_i32_15 : i32 to vector<2x128xi32>
      %35 = arith.select %33, %24, %34 : vector<2x128xi1>, vector<2x128xi32>
      %cst_16 = arith.constant dense<2147483647> : vector<2xi32>
      %36 = vector.multi_reduction <minsi>, %35, %cst_16 [1] : vector<2x128xi32> to vector<2xi32>
      %37 = vector.shape_cast %36 : vector<2xi32> to vector<1x2xi32>
      %c0_17 = arith.constant 0 : index
      %c0_18 = arith.constant 0 : index
      %38 = vector.load %arg3[%c0_17, %c0_18] : memref<1x2xi32, #tpu.memory_space<vmem>>, vector<1x2xi32>
      tpu.vector_store %arg3[%c0_17, %c0_18], %37 {strides = array<i32>} : memref<1x2xi32, #tpu.memory_space<vmem>>, vector<1x2xi32>,
    } else {
    }
    return
  }
  func.func @transform_0(%arg0: i32, %arg1: i32) -> (i32, i32) {
    %c0_i32 = arith.constant 0 : i32
    return %arg0, %arg1 : i32, i32
  }
  func.func @transform_1(%arg0: i32, %arg1: i32) -> (i32, i32) {
    %c0_i32 = arith.constant 0 : i32
    %c0_i32_0 = arith.constant 0 : i32
    return %c0_i32, %arg0 : i32, i32
  }
}

</mosaic_0001>

<bundles_post_ra>
// kernel: tpu_custom_call.1
= control target key start
LH: loop header
LB: loop body
LE: loop exit
PB: predicated region body
PF: predicated region fallthrough
CT: control target
= control target key end

     0   :  { %6 = vsyncpa [#allocation5], 0  ;;  %s160_s0 = inlined_call_operand.hbm [shape: f32[2,1024], index: 0, kind: input, shape index: {}]   ;;  %s161_s1 = inlined_call_operand.hbm [shape: s32[1,2], index: 1, kind: output, shape index: {}]  }
   0x1   :  { %7 = vsyncpa [#allocation6], 0  ;;  %s140_s6 = smov [#allocation4]  }
   0x2   :  { %s14_s7 = sshll.u32 %s140_s6, 4  ;;  %s15_s7 = int_to_ptr.vmem [resolvable:$true] %s14_s7 }
   0x3   :  { %s104_s8 = scalar_lea.vmem %s15_s7, 64  ;;  %p109_p1 = scmp.lt.s32.totalorder %s15_s7, %s15_s7 }
   0x4   :  { %p105_p0 = scmp.ne.s32.totalorder %s15_s7, %s104_s8  ;;  %p110_p2 = scmp.lt.s32.totalorder %s104_s8, %s104_s8 }
   0x6   :  { %p111_p3 = por %p110_p2, %p109_p1 }
   0x8   :  { %p112_p4 = pnand %p111_p3, %p105_p0 }
   0xa   :  { %115 = shalt.err (!%p112_p4)
}
   0xb   :  { %17 = dma.hbm_to_vmem [thread:$0]  %s160_s0, 64, %s15_s7, [#allocation5]  }
   0xc   :  { %136 = dma.done.wait [#allocation5], 64  }
   0xd   :  { %137 = vsyncadd [#allocation5], 4294967232  ;;  %v27_v0 = vlaneseq  ;;  %v141_v1 = vmov -inf   ;;  %v142_v2 = vmov 0   ;;  %v32_v4 = vld [vmem:[#allocation4] sm:$0x3] }
   0xe   :  { %25 = vst [vmem:[#allocation2] sm:$0x3] %v141_v1  ;;  %26 = vst [vmem:[#allocation3] sm:$0x3] %v142_v2  ;;  %v38_v7 = vld [vmem:[#allocation4 + $0x2] sm:$0x3] }
   0xf   :  { %v28_v3 = vand.u32 127, %v27_v0  ;;  %vm50_vm1 = vcmask 1041408   ;;  %v72_v24 = vshrl.u32 %v27_v0, 7  ;;  %s143_s0 = smov [#allocation7]   ;;  %vm75_vm5 = vcmask 8192  }
  0x10   :  { %s83_s11 = sshll.u32 %s143_s0, 4  ;;  %s84_s11 = int_to_ptr.vmem [resolvable:$true] %s83_s11 }
  0x11   :  { %v41_v5 = vadd.s32 128, %v28_v3  ;;  %v73_v27 = vsub.s32 %v28_v3, %v72_v24  ;;  %s116_s12 = scalar_lea.vmem %s84_s11, 16  ;;  %s120_s13 = scalar_lea.vmem %s84_s11, 32 }
  0x12   :  { %p117_p5 = scmp.ne.s32.totalorder %s84_s11, %s116_s12  ;;  %p121_p6 = scmp.lt.s32.totalorder %s84_s11, %s84_s11 }
  0x13   :  { %p122_p7 = scmp.lt.s32.totalorder %s120_s13, %s116_s12 }
  0x15   :  { %v30_v6 = vld [vmem:[#allocation2] sm:$0x3]  ;;  %v31_v8 = vld [vmem:[#allocation3] sm:$0x3]  ;;  %p123_p8 = por %p122_p7, %p121_p6 }
  0x16   :  { %vm35_vm0 = vcmp.gt.f32.partialorder %v32_v4, %v30_v6 }
  0x17   :  { %v36_v9 = vsel %vm35_vm0, %v32_v4, %v30_v6  ;;  %v37_v10 = vsel %vm35_vm0, %v28_v3, %v31_v8  ;;  %p124_p9 = pnand %p123_p8, %p117_p5 }
  0x18   :  { %vm42_vm2 = vcmp.gt.f32.partialorder %v38_v7, %v36_v9 }
  0x19   :  { %v43_v11 = vsel %vm42_vm2, %v38_v7, %v36_v9  ;;  %v44_v12 = vsel %vm42_vm2, %v41_v5, %v37_v10 }
  0x1a   :  { %v51_v13 = vsel %vm50_vm1, %v43_v11, -inf  ;;  %45 = vst [vmem:[#allocation2] sm:$0x3] %v43_v11  ;;  %46 = vst [vmem:[#allocation3] sm:$0x3] %v44_v12 }
  0x1b   :  { %52 = vmax.xlane.f32.xlu0 %v51_v13 }
  0xa4   :  { %v53_v14 = vpop.xlane.xlu0 %52 }
  0xa5   :  { %vm54_vm3 = vcmp.eq.f32.partialorder %v43_v11, %v53_v14 }
  0xa6   :  { %v55_v15 = vsel %vm54_vm3, %v44_v12, 256 }
  0xa7   :  { %v56_v16 = vsel %vm50_vm1, %v55_v15, 2147483647 }
  0xa8   :  { %v58_v17 = vshra.s32 %v56_v16, 16  ;;  %v57_v19 = vand.u32 65535, %v56_v16 }
  0xaa   :  { %v60_v18 = vcvt.s32.f32 %v58_v17  ;;  %v59_v21 = vcvt.s32.f32 %v57_v19 }
  0xac   :  { %61 = vmin.xlane.f32.xlu0 %v60_v18 }
 0x135   :  { %v62_v20 = vpop.xlane.xlu0 %61 }
 0x136   :  { %vm63_vm4 = vcmp.eq.f32.partialorder %v60_v18, %v62_v20  ;;  %v68_v23 = vcvt.f32.s32 %v62_v20 }
 0x137   :  { %v64_v22 = vsel %vm63_vm4, %v59_v21, inf }
 0x138   :  { %65 = vmin.xlane.f32.xlu1 %v64_v22  ;;  %v69_v26 = vshll.u32 %v68_v23, 16 }
 0x1c1   :  { %v66_v25 = vpop.xlane.xlu1 %65 }
 0x1c2   :  { %v67_v28 = vcvt.f32.s32 %v66_v25 }
 0x1c4   :  { %v70_v29 = vadd.s32 %v69_v26, %v67_v28 }
 0x1c6   :  { %v74_v30 = vrot.slane %v70_v29, %v73_v27 }
 0x1c8   :  { %76 = vst.msk [vmem:[#allocation7] sm:$0x1] %vm75_vm5, %v74_v30 }
 0x1c9   :  { %127 = shalt.err (!%p124_p9)
}
 0x1ca   :  { %86 = dma.vmem_to_hbm [thread:$0]  %s84_s11, 16, %s161_s1, [#allocation6]  }
 0x1cb   :  { %138 = dma.done.wait [#allocation6], 16  }
 0x1cc   :  { %139 = vsyncadd [#allocation6], 4294967280 }
 0x1cd   :  { %90 = vsyncpa [#allocation5], 1 }
 0x1ce   :  { %91 = vsyncpa [#allocation6], 1 }

</bundles_post_ra>
